<compile_context>
chip_gen: v7x
topology: tpu7x:2x2x1
jax: 0.10.0
libtpu: 0.0.40
codegen_flags: <defaults>
</compile_context>

<pallas_src>
import jax
import jax.numpy as jnp
from jax.experimental import pallas as pl
from jax.experimental.pallas import tpu as pltpu


# ----------------------------------------------------------------------------
# Fused forward kernel: gathers + SPR MLP + RCC MLP + combined output slab
# ----------------------------------------------------------------------------
def _kg_fused_kernel(heads_ref, rels_ref, tails_ref,
                     ent_tab_ref, rel_tab_ref,
                     spr_w1_ref, spr_b1_ref, spr_w2_ref, spr_b2_ref,
                     rcc_w1_ref, rcc_b1_ref, rcc_w2_ref, rcc_b2_ref,
                     out_ref):
    b = heads_ref.shape[0]
    ent_tab = ent_tab_ref[...]                      # [Ne, D]
    rel_tab = rel_tab_ref[...]                      # [Nr, D]
    n_ent = ent_tab.shape[0]
    n_rel = rel_tab.shape[0]

    # ---- bulk embedding gather via one-hot matmul (MXU, single step) ----
    # head + tail ids stacked so the entity gather and the SPR encoder run once.
    ent_ids = jnp.concatenate([heads_ref[...], tails_ref[...]], axis=0)   # [2B, 1]
    iota_e = jax.lax.broadcasted_iota(jnp.int32, (2 * b, n_ent), 1)
    onehot_e = (ent_ids == iota_e).astype(jnp.float32)                    # [2B, Ne]
    ht_emb = jnp.dot(onehot_e, ent_tab,
                     preferred_element_type=jnp.float32)                  # [2B, D]

    iota_r = jax.lax.broadcasted_iota(jnp.int32, (b, n_rel), 1)
    onehot_r = (rels_ref[...] == iota_r).astype(jnp.float32)              # [B, Nr]
    rel_emb = jnp.dot(onehot_r, rel_tab,
                      preferred_element_type=jnp.float32)                 # [B, D]

    # ---- SPR encoder: Linear(D,H) -> ReLU -> Linear(H,D), on stacked rows ----
    h = jnp.dot(ht_emb, spr_w1_ref[...], preferred_element_type=jnp.float32)
    h = jnp.maximum(h + spr_b1_ref[...], 0.0)                             # [2B, H]
    spr = jnp.dot(h, spr_w2_ref[...], preferred_element_type=jnp.float32)
    spr = spr + spr_b2_ref[...]                                           # [2B, D]
    head_spr = spr[:b]                                                    # [B, D]
    tail_spr = spr[b:]                                                    # [B, D]

    # ---- RCC module on cat([head_spr, tail_spr]): Linear(2D,2D)->ReLU->Linear(2D,8)
    rcc_in = jnp.concatenate([head_spr, tail_spr], axis=-1)               # [B, 2D]
    h2 = jnp.dot(rcc_in, rcc_w1_ref[...], preferred_element_type=jnp.float32)
    h2 = jnp.maximum(h2 + rcc_b1_ref[...], 0.0)                           # [B, 2D]
    spatial = jnp.dot(h2, rcc_w2_ref[...], preferred_element_type=jnp.float32)
    spatial = spatial + rcc_b2_ref[...]                                   # [B, 8]

    # ---- lane-dense combined output slab: [ spatial | state | zero pad ] ----
    # state = cat([head_spr, rel_emb, tail_spr], -1) (input to policy / metacog).
    pieces = [spatial, head_spr, rel_emb, tail_spr]
    used = sum(p.shape[-1] for p in pieces)
    pad = out_ref.shape[-1] - used
    if pad > 0:
        pieces.append(jnp.zeros((b, pad), jnp.float32))
    out_ref[...] = jnp.concatenate(pieces, axis=-1).astype(out_ref.dtype)


# ----------------------------------------------------------------------------
# Wrapper: one pallas_call for the whole forward
# ----------------------------------------------------------------------------
def kg_model_forward(params, heads, relations, tails):
    b = heads.shape[0]
    d = params["ent_emb"].shape[1]
    n_logical = 8 + 3 * d                                  # spatial + state columns
    out_cols = max(128, ((n_logical + 127) // 128) * 128)  # lane-dense (multiple of 128)

    heads2 = heads.astype(jnp.int32).reshape(b, 1)
    rels2 = relations.astype(jnp.int32).reshape(b, 1)
    tails2 = tails.astype(jnp.int32).reshape(b, 1)

    args = (heads2, rels2, tails2,
            params["ent_emb"], params["rel_emb"],
            params["spr_w1"], params["spr_b1"], params["spr_w2"], params["spr_b2"],
            params["rcc_w1"], params["rcc_b1"], params["rcc_w2"], params["rcc_b2"])

    vmem_spec = pl.BlockSpec(memory_space=pltpu.MemorySpace.VMEM)

    slab = pl.pallas_call(
        _kg_fused_kernel,
        out_shape=jax.ShapeDtypeStruct((b, out_cols), jnp.float32),
        in_specs=[vmem_spec] * len(args),
        out_specs=vmem_spec,
    )(*args)

    spatial_relations = slab[:, :8]                        # [B, 8]
    state = slab[:, 8:8 + 3 * d]                           # [B, 3D]

    # TODO(synk): GRPOPolicy, MetacognitiveModule, RewardCalculator and AhaDetector
    # are not defined in the provided source, so the sampled `actions` and `metacog`
    # outputs cannot be translated; we return the spatial relations and the
    # policy/metacog input `state` instead.
    return spatial_relations, state


kg_model_forward_jit = jax.jit(kg_model_forward)


# ----------------------------------------------------------------------------
# Parameter construction (deterministic, synthetic)
# ----------------------------------------------------------------------------
def init_kg_params(key, num_entities, num_relations, embedding_dim, hidden_dim):
    ks = jax.random.split(key, 12)
    s = 0.05
    D, H = embedding_dim, hidden_dim
    return {
        # nn.Embedding tables
        "ent_emb": jax.random.normal(ks[0], (num_entities, D), jnp.float32) * s,
        "rel_emb": jax.random.normal(ks[1], (num_relations, D), jnp.float32) * s,
        # SPREncoder: Linear(D, H) -> ReLU -> Linear(H, D)
        "spr_w1": jax.random.normal(ks[2], (D, H), jnp.float32) * s,
        "spr_b1": jax.random.normal(ks[3], (1, H), jnp.float32) * s,
        "spr_w2": jax.random.normal(ks[4], (H, D), jnp.float32) * s,
        "spr_b2": jax.random.normal(ks[5], (1, D), jnp.float32) * s,
        # RCCModule: Linear(2D, 2D) -> ReLU -> Linear(2D, 8)
        # (input_dim fixed to 2*D so the forward is runnable; see NOTE above)
        "rcc_w1": jax.random.normal(ks[6], (2 * D, 2 * D), jnp.float32) * s,
        "rcc_b1": jax.random.normal(ks[7], (1, 2 * D), jnp.float32) * s,
        "rcc_w2": jax.random.normal(ks[8], (2 * D, 8), jnp.float32) * s,
        "rcc_b2": jax.random.normal(ks[9], (1, 8), jnp.float32) * s,
    }


# ----------------------------------------------------------------------------
# Pure-JAX reference for correctness checking
# ----------------------------------------------------------------------------
def _ref_forward(params, heads, relations, tails):
    head_emb = params["ent_emb"][heads]
    rel_emb = params["rel_emb"][relations]
    tail_emb = params["ent_emb"][tails]

    def spr(x):
        h = jnp.maximum(x @ params["spr_w1"] + params["spr_b1"], 0.0)
        return h @ params["spr_w2"] + params["spr_b2"]

    head_spr, tail_spr = spr(head_emb), spr(tail_emb)
    rcc_in = jnp.concatenate([head_spr, tail_spr], axis=-1)
    h = jnp.maximum(rcc_in @ params["rcc_w1"] + params["rcc_b1"], 0.0)
    spatial = h @ params["rcc_w2"] + params["rcc_b2"]
    state = jnp.concatenate([head_spr, rel_emb, tail_spr], axis=-1)
    return spatial, state


if __name__ == "__main__":
    # small, module-consistent shapes
    NUM_ENTITIES = 32
    NUM_RELATIONS = 8
    EMBEDDING_DIM = 32
    HIDDEN_DIM = 64
    B = 8  # number of (head, relation, tail) triples

    key = jax.random.PRNGKey(0)
    pkey, hkey, rkey, tkey = jax.random.split(key, 4)

    params = init_kg_params(pkey, NUM_ENTITIES, NUM_RELATIONS,
                            EMBEDDING_DIM, HIDDEN_DIM)

    heads = jax.random.randint(hkey, (B,), 0, NUM_ENTITIES, dtype=jnp.int32)
    relations = jax.random.randint(rkey, (B,), 0, NUM_RELATIONS, dtype=jnp.int32)
    tails = jax.random.randint(tkey, (B,), 0, NUM_ENTITIES, dtype=jnp.int32)

    spatial, state = kg_model_forward_jit(params, heads, relations, tails)
    spatial = jax.block_until_ready(spatial)
    state = jax.block_until_ready(state)

    ref_spatial, ref_state = _ref_forward(params, heads, relations, tails)

    assert spatial.shape == (B, 8), spatial.shape
    assert state.shape == (B, 3 * EMBEDDING_DIM), state.shape
    assert jnp.allclose(spatial, ref_spatial, atol=2e-5, rtol=2e-5)
    assert jnp.allclose(state, ref_state, atol=2e-5, rtol=2e-5)

    print("KERNEL_OK")
</pallas_src>

<mosaic_0001>
module attributes {stable_mosaic.version = 11 : i64} {
  func.func @_kg_fused_kernel(%arg0: memref<8x1xi32, #tpu.memory_space<vmem>>, %arg1: memref<8x1xi32, #tpu.memory_space<vmem>>, %arg2: memref<8x1xi32, #tpu.memory_space<vmem>>, %arg3: memref<32x32xf32, #tpu.memory_space<vmem>>, %arg4: memref<8x32xf32, #tpu.memory_space<vmem>>, %arg5: memref<32x64xf32, #tpu.memory_space<vmem>>, %arg6: memref<1x64xf32, #tpu.memory_space<vmem>>, %arg7: memref<64x32xf32, #tpu.memory_space<vmem>>, %arg8: memref<1x32xf32, #tpu.memory_space<vmem>>, %arg9: memref<64x64xf32, #tpu.memory_space<vmem>>, %arg10: memref<1x64xf32, #tpu.memory_space<vmem>>, %arg11: memref<64x8xf32, #tpu.memory_space<vmem>>, %arg12: memref<1x8xf32, #tpu.memory_space<vmem>>, %arg13: memref<8x128xf32, #tpu.memory_space<vmem>>) attributes {dimension_semantics = [], scalar_prefetch = 0 : i64, scratch_operands = 0 : i64, tpu.core_type = #tpu.core_type<tc>} {
    %c0 = arith.constant 0 : index
    %c0_0 = arith.constant 0 : index
    %0 = vector.load %arg3[%c0, %c0_0] : memref<32x32xf32, #tpu.memory_space<vmem>>, vector<32x32xf32>
    %c0_1 = arith.constant 0 : index
    %c0_2 = arith.constant 0 : index
    %1 = vector.load %arg4[%c0_1, %c0_2] : memref<8x32xf32, #tpu.memory_space<vmem>>, vector<8x32xf32>
    %c0_3 = arith.constant 0 : index
    %c0_4 = arith.constant 0 : index
    %2 = vector.load %arg0[%c0_3, %c0_4] : memref<8x1xi32, #tpu.memory_space<vmem>>, vector<8x1xi32>
    %c0_5 = arith.constant 0 : index
    %c0_6 = arith.constant 0 : index
    %3 = vector.load %arg2[%c0_5, %c0_6] : memref<8x1xi32, #tpu.memory_space<vmem>>, vector<8x1xi32>
    %4 = tpu.concatenate %2, %3 in 0 : vector<8x1xi32>, vector<8x1xi32> -> vector<16x1xi32>
    %5 = tpu.iota {dimensions = array<i32: 1>} : vector<16x32xi32>
    %6 = vector.broadcast %4 : vector<16x1xi32> to vector<16x32xi32>
    %7 = arith.cmpi eq, %6, %5 : vector<16x32xi32>
    %8 = arith.extui %7 : vector<16x32xi1> to vector<16x32xi32>
    %9 = arith.sitofp %8 : vector<16x32xi32> to vector<16x32xf32>
    %cst = arith.constant dense<0.000000e+00> : vector<16x32xf32>
    %10 = tpu.matmul %9, %0, %cst {dimension_numbers = #tpu.dot_dimension_numbers<[1], [0], [0], [1], [0, 0, 1, 1], [], []>} : vector<16x32xf32>, vector<32x32xf32>, vector<16x32xf32> -> vector<16x32xf32>
    %11 = tpu.iota {dimensions = array<i32: 1>} : vector<8x8xi32>
    %c0_7 = arith.constant 0 : index
    %c0_8 = arith.constant 0 : index
    %12 = vector.load %arg1[%c0_7, %c0_8] : memref<8x1xi32, #tpu.memory_space<vmem>>, vector<8x1xi32>
    %13 = vector.broadcast %12 : vector<8x1xi32> to vector<8x8xi32>
    %14 = arith.cmpi eq, %13, %11 : vector<8x8xi32>
    %15 = arith.extui %14 : vector<8x8xi1> to vector<8x8xi32>
    %16 = arith.sitofp %15 : vector<8x8xi32> to vector<8x8xf32>
    %cst_9 = arith.constant dense<0.000000e+00> : vector<8x32xf32>
    %17 = tpu.matmul %16, %1, %cst_9 {dimension_numbers = #tpu.dot_dimension_numbers<[1], [0], [0], [1], [0, 0, 1, 1], [], []>} : vector<8x8xf32>, vector<8x32xf32>, vector<8x32xf32> -> vector<8x32xf32>
    %c0_10 = arith.constant 0 : index
    %c0_11 = arith.constant 0 : index
    %18 = vector.load %arg5[%c0_10, %c0_11] : memref<32x64xf32, #tpu.memory_space<vmem>>, vector<32x64xf32>
    %cst_12 = arith.constant dense<0.000000e+00> : vector<16x64xf32>
    %19 = tpu.matmul %10, %18, %cst_12 {dimension_numbers = #tpu.dot_dimension_numbers<[1], [0], [0], [1], [0, 0, 1, 1], [], []>} : vector<16x32xf32>, vector<32x64xf32>, vector<16x64xf32> -> vector<16x64xf32>
    %c0_13 = arith.constant 0 : index
    %c0_14 = arith.constant 0 : index
    %20 = vector.load %arg6[%c0_13, %c0_14] : memref<1x64xf32, #tpu.memory_space<vmem>>, vector<1x64xf32>
    %21 = vector.broadcast %20 : vector<1x64xf32> to vector<16x64xf32>
    %22 = arith.addf %19, %21 : vector<16x64xf32>
    %cst_15 = arith.constant 0.000000e+00 : f32
    %23 = vector.broadcast %cst_15 : f32 to vector<16x64xf32>
    %24 = arith.maximumf %22, %23 : vector<16x64xf32>
    %c0_16 = arith.constant 0 : index
    %c0_17 = arith.constant 0 : index
    %25 = vector.load %arg7[%c0_16, %c0_17] : memref<64x32xf32, #tpu.memory_space<vmem>>, vector<64x32xf32>
    %cst_18 = arith.constant dense<0.000000e+00> : vector<16x32xf32>
    %26 = tpu.matmul %24, %25, %cst_18 {dimension_numbers = #tpu.dot_dimension_numbers<[1], [0], [0], [1], [0, 0, 1, 1], [], []>} : vector<16x64xf32>, vector<64x32xf32>, vector<16x32xf32> -> vector<16x32xf32>
    %c0_19 = arith.constant 0 : index
    %c0_20 = arith.constant 0 : index
    %27 = vector.load %arg8[%c0_19, %c0_20] : memref<1x32xf32, #tpu.memory_space<vmem>>, vector<1x32xf32>
    %28 = vector.broadcast %27 : vector<1x32xf32> to vector<16x32xf32>
    %29 = arith.addf %26, %28 : vector<16x32xf32>
    %30 = vector.extract_strided_slice %29 {offsets = [0, 0], sizes = [8, 32], strides = [1, 1]} : vector<16x32xf32> to vector<8x32xf32>
    %31 = vector.extract_strided_slice %29 {offsets = [8, 0], sizes = [8, 32], strides = [1, 1]} : vector<16x32xf32> to vector<8x32xf32>
    %32 = tpu.concatenate %30, %31 in 1 : vector<8x32xf32>, vector<8x32xf32> -> vector<8x64xf32>
    %c0_21 = arith.constant 0 : index
    %c0_22 = arith.constant 0 : index
    %33 = vector.load %arg9[%c0_21, %c0_22] : memref<64x64xf32, #tpu.memory_space<vmem>>, vector<64x64xf32>
    %cst_23 = arith.constant dense<0.000000e+00> : vector<8x64xf32>
    %34 = tpu.matmul %32, %33, %cst_23 {dimension_numbers = #tpu.dot_dimension_numbers<[1], [0], [0], [1], [0, 0, 1, 1], [], []>} : vector<8x64xf32>, vector<64x64xf32>, vector<8x64xf32> -> vector<8x64xf32>
    %c0_24 = arith.constant 0 : index
    %c0_25 = arith.constant 0 : index
    %35 = vector.load %arg10[%c0_24, %c0_25] : memref<1x64xf32, #tpu.memory_space<vmem>>, vector<1x64xf32>
    %36 = vector.broadcast %35 : vector<1x64xf32> to vector<8x64xf32>
    %37 = arith.addf %34, %36 : vector<8x64xf32>
    %cst_26 = arith.constant 0.000000e+00 : f32
    %38 = vector.broadcast %cst_26 : f32 to vector<8x64xf32>
    %39 = arith.maximumf %37, %38 : vector<8x64xf32>
    %c0_27 = arith.constant 0 : index
    %c0_28 = arith.constant 0 : index
    %40 = vector.load %arg11[%c0_27, %c0_28] : memref<64x8xf32, #tpu.memory_space<vmem>>, vector<64x8xf32>
    %cst_29 = arith.constant dense<0.000000e+00> : vector<8x8xf32>
    %41 = tpu.matmul %39, %40, %cst_29 {dimension_numbers = #tpu.dot_dimension_numbers<[1], [0], [0], [1], [0, 0, 1, 1], [], []>} : vector<8x64xf32>, vector<64x8xf32>, vector<8x8xf32> -> vector<8x8xf32>
    %c0_30 = arith.constant 0 : index
    %c0_31 = arith.constant 0 : index
    %42 = vector.load %arg12[%c0_30, %c0_31] : memref<1x8xf32, #tpu.memory_space<vmem>>, vector<1x8xf32>
    %43 = vector.broadcast %42 : vector<1x8xf32> to vector<8x8xf32>
    %44 = arith.addf %41, %43 : vector<8x8xf32>
    %cst_32 = arith.constant 0.000000e+00 : f32
    %45 = vector.broadcast %cst_32 : f32 to vector<8x24xf32>
    %46 = tpu.concatenate %44, %30, %17, %31, %45 in 1 : vector<8x8xf32>, vector<8x32xf32>, vector<8x32xf32>, vector<8x32xf32>, vector<8x24xf32> -> vector<8x128xf32>
    %c0_33 = arith.constant 0 : index
    %c0_34 = arith.constant 0 : index
    %47 = vector.load %arg13[%c0_33, %c0_34] : memref<8x128xf32, #tpu.memory_space<vmem>>, vector<8x128xf32>
    tpu.vector_store %arg13[%c0_33, %c0_34], %46 {strides = array<i32>} : memref<8x128xf32, #tpu.memory_space<vmem>>, vector<8x128xf32>,
    return
  }
}

</mosaic_0001>

<bundles_post_ra>
// kernel: kg_model_forward.1
= control target key start
LH: loop header
LB: loop body
LE: loop exit
PB: predicated region body
PF: predicated region fallthrough
CT: control target
= control target key end

     0   :  { %v832_v0 = vmov 0   ;;  %v833_v9 = vmov 0.0   ;;  %v51_v13 = vlaneseq  ;;  %vm65_vm0 = vcmask 261120   ;;  %s836_s26 = smov 32   ;;  %s838_s27 = smov 40   ;;  %s1054_s0 = inlined_call_operand.vmem [shape: s32[8,1], index: 0, kind: input, shape index: {}]   ;;  %s1055_s2 = inlined_call_operand.vmem [shape: s32[8,1], index: 2, kind: input, shape index: {}]   ;;  %s1056_s3 = inlined_call_operand.vmem [shape: f32[32,32], index: 3, kind: input, shape index: {}]   ;;  %s1057_s5 = inlined_call_operand.vmem [shape: f32[32,64], index: 5, kind: input, shape index: {}]   ;;  %s1058_s1 = inlined_call_operand.vmem [shape: s32[8,1], index: 1, kind: input, shape index: {}]   ;;  %s1059_s4 = inlined_call_operand.vmem [shape: f32[8,32], index: 4, kind: input, shape index: {}]   ;;  %s1060_s7 = inlined_call_operand.vmem [shape: f32[64,32], index: 7, kind: input, shape index: {}]   ;;  %s1061_s6 = inlined_call_operand.vmem [shape: f32[1,64], index: 6, kind: input, shape index: {}]   ;;  %s1062_s9 = inlined_call_operand.vmem [shape: f32[64,64], index: 9, kind: input, shape index: {}]   ;;  %s1063_s11 = inlined_call_operand.vmem [shape: f32[64,8], index: 11, kind: input, shape index: {}]   ;;  %s1064_s8 = inlined_call_operand.vmem [shape: f32[1,32], index: 8, kind: input, shape index: {}]   ;;  %s1065_s10 = inlined_call_operand.vmem [shape: f32[1,64], index: 10, kind: input, shape index: {}]   ;;  %s1066_s12 = inlined_call_operand.vmem [shape: f32[1,8], index: 12, kind: input, shape index: {}]   ;;  %s1067_s13 = inlined_call_operand.vmem [shape: f32[8,128], index: 13, kind: output, shape index: {}]  }
   0x1   :  { %830 = vset.pattern.permute.xlu0 %v832_v0  ;;  %v49_v1 = vld [vmem:[%s1054_s0] sm:$0xff]  ;;  %831 = vset.pattern.permute.xlu1 %v832_v0  ;;  %v45_v3 = vld [vmem:[%s1056_s3 + $0x8] sm:$0xff]  ;;  %v46_v4 = vld [vmem:[%s1056_s3 + $0x10] sm:$0xff]  ;;  %vm834_vm3 = vmmov 0   ;;  %vm154_vm4 = vcmask 64512   ;;  %vm337_vm6 = vcmask 523264  }
   0x2   :  { %v44_v2 = vld [vmem:[%s1056_s3] sm:$0xff]  ;;  %54 = vperm.xlu0 %830, %v49_v1   ;;  %v47_v5 = vld [vmem:[%s1056_s3 + $0x18] sm:$0xff]  ;;  %693 = vmatprep.subr.mxu0 %v833_v9  ;;  %v229_v11 = vld [vmem:[%s1057_s5 + $0x8] sm:$0xff]  ;;  %v52_v14 = vand.u32 127, %v51_v13  ;;  %v835_v49 = vmov 0.0|0.0   ;;  %s839_s28 = smov 72  }
   0x3   :  { %v50_v6 = vld [vmem:[%s1055_s2] sm:$0xff]  ;;  %v766_v7 = vpack.c.bf16 %v45_v3, %v44_v2  ;;  %v770_v8 = vpack.c.bf16 %v47_v5, %v46_v4  ;;  %v230_v17 = vld [vmem:[%s1057_s5 + $0x10] sm:$0xff]  ;;  %v231_v18 = vld [vmem:[%s1057_s5 + $0x18] sm:$0xff]  ;;  %695 = vmatprep.mubr.msk.f32.mxu0 %vm834_vm3, %v833_v9  ;;  %vm613_vm7 = vcmask 326656   ;;  %vm615_vm8 = vcmask 588800  }
   0x4   :  { %v228_v10 = vld [vmem:[%s1057_s5] sm:$0xff]  ;;  %v778_v20 = vpack.c.bf16 %v231_v18, %v230_v17  ;;  %v323_v25 = vld [vmem:[%s1060_s7 + $0x8] sm:$0xff]  ;;  %v324_v29 = vld [vmem:[%s1060_s7 + $0x10] sm:$0xff]  ;;  %vm617_vm9 = vcmask 850944  }
   0x5   :  { %767 = vmatprep.subr.bf16.mxu1 %v766_v7  ;;  %v774_v12 = vpack.c.bf16 %v229_v11, %v228_v10  ;;  %v147_v22 = vld [vmem:[%s1058_s1] sm:$0xff]  ;;  %v325_v30 = vld [vmem:[%s1060_s7 + $0x18] sm:$0xff]  ;;  %v327_v35 = vld [vmem:[%s1060_s7 + $0x28] sm:$0xff] }
   0x6   :  { %57 = vperm.xlu0 %830, %v50_v6   ;;  %769 = vmatpush3.bf16.msra.mxu1 %v766_v7  ;;  %v48_v23 = vld [vmem:[%s1059_s4] sm:$0xff]  ;;  %v786_v32 = vpack.c.bf16 %v325_v30, %v324_v29  ;;  %v328_v37 = vld [vmem:[%s1060_s7 + $0x30] sm:$0xff]  ;;  %v329_v38 = vld [vmem:[%s1060_s7 + $0x38] sm:$0xff] }
   0x7   :  { %771 = vmatprep.subr.bf16.mxu1 %v770_v8  ;;  %149 = vperm.xlu1 %831, %v147_v22   ;;  %v322_v24 = vld [vmem:[%s1060_s7] sm:$0xff]  ;;  %v794_v39 = vpack.c.bf16 %v329_v38, %v328_v37  ;;  %v425_v51 = vld [vmem:[%s1062_s9 + $0x8] sm:$0xff]  ;;  %v426_v52 = vld [vmem:[%s1062_s9 + $0x10] sm:$0xff] }
   0x8   :  { %694 = vmatpush3.msra.mxu0 %v48_v23  ;;  %v782_v26 = vpack.c.bf16 %v323_v25, %v322_v24  ;;  %v326_v34 = vld [vmem:[%s1060_s7 + $0x20] sm:$0xff]  ;;  %v427_v54 = vld [vmem:[%s1062_s9 + $0x18] sm:$0xff]  ;;  %v429_v57 = vld [vmem:[%s1062_s9 + $0x28] sm:$0xff] }
   0x9   :  { %v790_v36 = vpack.c.bf16 %v327_v35, %v326_v34  ;;  %v630_v40 = vld [vmem:[%s1061_s6] ss:$0 sm:$0xff]  ;;  %v802_v55 = vpack.c.bf16 %v427_v54, %v426_v52  ;;  %v430_v59 = vld [vmem:[%s1062_s9 + $0x30] sm:$0xff]  ;;  %v431_v60 = vld [vmem:[%s1062_s9 + $0x38] sm:$0xff] }
   0xa   :  { %773 = vmatpush3.bf16.msra.mxu1 %v770_v8  ;;  %783 = vmatprep.subr.bf16.mxu0 %v782_v26  ;;  %v424_v50 = vld [vmem:[%s1062_s9] sm:$0xff]  ;;  %v808_v61 = vpack.c.bf16 %v431_v60, %v430_v59  ;;  %v514_v63 = vld [vmem:[%s1063_s11 + $0x8] sm:$0xff]  ;;  %v515_v0 = vld [vmem:[%s1063_s11 + $0x10] sm:$0xff] }
   0xb   :  { %775 = vmatprep.subr.bf16.mxu1 %v774_v12  ;;  %v799_v53 = vpack.c.bf16 %v425_v51, %v424_v50  ;;  %v428_v56 = vld [vmem:[%s1062_s9 + $0x20] sm:$0xff]  ;;  %v516_v2 = vld [vmem:[%s1063_s11 + $0x18] sm:$0xff]  ;;  %v518_v6 = vld [vmem:[%s1063_s11 + $0x28] sm:$0xff] }
   0xc   :  { %v805_v58 = vpack.c.bf16 %v429_v57, %v428_v56  ;;  %v513_v62 = vld [vmem:[%s1063_s11] sm:$0xff]  ;;  %v814_v4 = vpack.c.bf16 %v516_v2, %v515_v0 }
   0xd   :  { %v811_v1 = vpack.c.bf16 %v514_v63, %v513_v62  ;;  %v633_v3 = vld [vmem:[%s1064_s8] ss:$0 sm:$0xff]  ;;  %s837_s8 = smov 8  }
   0xe   :  { %v517_v5 = vld [vmem:[%s1063_s11 + $0x20] sm:$0xff] }
   0xf   :  { %v817_v11 = vpack.c.bf16 %v518_v6, %v517_v5  ;;  %v636_v17 = vld [vmem:[%s1065_s10] ss:$0 sm:$0xff] }
  0x10   :  { %v638_v23 = vld [vmem:[%s1066_s12] ss:$0 sm:$0xff] }
  0x81   :  { %v55_v15 = vpop.permute.xlu0 %54 }
  0x82   :  { %vm59_vm1 = vcmp.eq.s32.totalorder %v55_v15, %v52_v14  ;;  %v520_v15 = vld [vmem:[%s1063_s11 + $0x38] sm:$0xff] }
  0x83   :  { %v624_v16 = vsel %vm59_vm1, 1.0, %v833_v9 }
  0x84   :  { %690 = vmatprep.mubr.msk.f32.mxu1 %vm65_vm0, %v624_v16 }
  0x85   :  { %v58_v19 = vpop.permute.xlu0 %57 }
  0x86   :  { %vm60_vm2 = vcmp.eq.s32.totalorder %v58_v19, %v52_v14  ;;  %v150_v31 = vpop.permute.xlu1 %149 }
  0x87   :  { %v625_v21 = vsel %vm60_vm2, 1.0, %v833_v9  ;;  %vm151_vm5 = vcmp.eq.s32.totalorder %v150_v31, %v52_v14  ;;  %v519_v14 = vld [vmem:[%s1063_s11 + $0x30] sm:$0xff] }
  0x88   :  { %691 = vmatmul.mubr.msk.f32.vlgmr.msra.gmra.mrb[0].mxu1 %vm65_vm0, %v625_v21  ;;  %v628_v33 = vsel %vm151_vm5, 1.0, %v833_v9  ;;  %v820_v16 = vpack.c.bf16 %v520_v15, %v519_v14 }
  0x89   :  { %777 = vmatpush3.bf16.msra.mxu1 %v774_v12  ;;  %696 = vmatmul.mubr.msk.f32.vlgmr.msra.gmra.mrb[0].mxu0 %vm154_vm4, %v628_v33 }
  0x8a   :  { %779 = vmatprep.subr.bf16.mxu1 %v778_v20  ;;  %785 = vmatpush3.bf16.msra.mxu0 %v782_v26 }
  0x8b   :  { %787 = vmatprep.subr.bf16.mxu0 %v786_v32 }
  0x8d   :  { %781 = vmatpush3.bf16.msra.mxu1 %v778_v20 }
  0x8e   :  { %789 = vmatpush3.bf16.msra.mxu0 %v786_v32  ;;  %798 = vmatprep.subr.bf16.mxu1 %v835_v49 }
  0x8f   :  { %791 = vmatprep.subr.bf16.mxu0 %v790_v36 }
  0x92   :  { %793 = vmatpush3.bf16.msra.mxu0 %v790_v36 }
  0x93   :  { %795 = vmatprep.subr.bf16.mxu0 %v794_v39 }
  0x96   :  { %797 = vmatpush3.bf16.msra.mxu0 %v794_v39 }
  0x97   :  { %810 = vmatprep.subr.bf16.mxu0 %v835_v49 }
 0x15b   :  { %v692_v27 = vpop.f32.mrb[0].mxu1 }
 0x15c   :  { %v138_v28 = vpop.f32.mrb[1].mxu1  ;;  %v224_v46 = vpop.f32.mrb[0].mxu0 }
 0x15d   :  { %706 = vmatprep.mubr.msk.f32.mxu1 %vm65_vm0, %v138_v28  ;;  %v697_v48 = vpop.f32.mrb[1].mxu0 }
 0x15e   :  { %707 = vmatmul.mubr.msk.f32.vlgmr.msra.gmra.mrb[2].mxu1 %vm65_vm0, %v692_v27 }
 0x15f   :  { %744 = vmatprep.mubr.msk.f32.mxu1 %vm834_vm3, %v833_v9  ;;  %800 = vmatpush3.bf16.msra.mxu1 %v799_v53 }
 0x160   :  { %801 = vmatprep.subr.bf16.mxu1 %v835_v49 }
 0x163   :  { %803 = vmatpush3.bf16.msra.mxu1 %v802_v55 }
 0x164   :  { %804 = vmatprep.subr.bf16.mxu1 %v835_v49 }
 0x167   :  { %806 = vmatpush3.bf16.msra.mxu1 %v805_v58 }
 0x168   :  { %807 = vmatprep.subr.bf16.mxu1 %v835_v49 }
 0x16b   :  { %809 = vmatpush3.bf16.msra.mxu1 %v808_v61 }
 0x231   :  { %v708_v41 = vpop.f32.mrb[2].mxu1 }
 0x232   :  { %v317_v42 = vadd.f32 %v708_v41, %v630_v40  ;;  %v311_v43 = vpop.f32.mrb[3].mxu1 }
 0x233   :  { %v312_v44 = vadd.f32 %v630_v40, %v311_v43 }
 0x234   :  { %v321_v47 = vmax.f32 %v317_v42, 0.0 }
 0x235   :  { %v320_v45 = vmax.f32 %v312_v44, 0.0 }
 0x237   :  { %725 = vmatprep.mubr.msk.f32.mxu0 %vm337_vm6, %v320_v45 }
 0x238   :  { %726 = vmatmul.mubr.msk.f32.vlgmr.msra.gmra.mrb[2].mxu0 %vm337_vm6, %v321_v47 }
 0x239   :  { %763 = vmatprep.mubr.msk.f32.mxu0 %vm834_vm3, %v833_v9  ;;  %812 = vmatpush3.bf16.msra.mxu0 %v811_v1 }
 0x23a   :  { %813 = vmatprep.subr.bf16.mxu0 %v835_v49 }
 0x23d   :  { %815 = vmatpush3.bf16.msra.mxu0 %v814_v4 }
 0x23e   :  { %816 = vmatprep.subr.bf16.mxu0 %v835_v49 }
 0x241   :  { %818 = vmatpush3.bf16.msra.mxu0 %v817_v11 }
 0x242   :  { %819 = vmatprep.subr.bf16.mxu0 %v835_v49 }
 0x245   :  { %821 = vmatpush3.bf16.msra.mxu0 %v820_v16 }
 0x30b   :  { %v727_v7 = vpop.f32.mrb[2].mxu0 }
 0x30c   :  { %v416_v8 = vadd.f32 %v727_v7, %v633_v3  ;;  %v410_v9 = vpop.f32.mrb[3].mxu0 }
 0x30d   :  { %v411_v10 = vadd.f32 %v633_v3, %v410_v9 }
 0x30e   :  { %420 = vrot.lane.b32.xlu1 %v416_v8, %s836_s26 }
 0x30f   :  { %602 = vrot.lane.b32.xlu0 %v411_v10, %s837_s8 }
 0x312   :  { %606 = vrot.lane.b32.xlu1 %v224_v46, %s838_s27 }
 0x313   :  { %609 = vrot.lane.b32.xlu0 %v416_v8, %s839_s28 }
 0x380   :  { %v421_v12 = vpop.permute.xlu1 %420 }
 0x381   :  { %v423_v13 = vsel %vm65_vm0, %v411_v10, %v421_v12  ;;  %v603_v22 = vpop.permute.xlu0 %602 }
 0x382   :  { %745 = vmatmul.mubr.msk.f32.vlgmr.msra.gmra.mrb[4].mxu1 %vm337_vm6, %v423_v13 }
 0x384   :  { %v607_v27 = vpop.permute.xlu1 %606 }
 0x385   :  { %v610_v29 = vpop.permute.xlu0 %609 }
 0x455   :  { %v508_v18 = vpop.f32.mrb[4].mxu1 }
 0x456   :  { %v509_v19 = vadd.f32 %v636_v17, %v508_v18  ;;  %v746_v20 = vpop.f32.mrb[5].mxu1 }
 0x458   :  { %v512_v21 = vmax.f32 %v509_v19, 0.0 }
 0x45a   :  { %764 = vmatmul.mubr.msk.f32.vlgmr.msra.gmra.mrb[4].mxu0 %vm337_vm6, %v512_v21 }
 0x52d   :  { %v597_v24 = vpop.f32.mrb[4].mxu0 }
 0x52e   :  { %v598_v25 = vadd.f32 %v638_v23, %v597_v24  ;;  %v765_v26 = vpop.f32.mrb[5].mxu0 }
 0x530   :  { %v612_v28 = vsel %vm154_vm4, %v598_v25, %v603_v22 }
 0x531   :  { %v614_v30 = vsel %vm613_vm7, %v612_v28, %v607_v27 }
 0x532   :  { %v616_v31 = vsel %vm615_vm8, %v614_v30, %v610_v29 }
 0x533   :  { %v618_v32 = vsel %vm617_vm9, %v616_v31, 0.0 }
 0x534   :  { %619 = vst [vmem:[%s1067_s13] sm:$0xff] %v618_v32 }

</bundles_post_ra>
